<compile_context>
chip_gen: v6e
topology: v6e:2x2x1
jax: 0.10.0
libtpu: 0.0.40
codegen_flags: <defaults>
</compile_context>

<pallas_src>
import jax
import jax.numpy as jnp
from jax.experimental import pallas as pl
from jax.experimental.pallas import tpu as pltpu


def _round_up(n: int, m: int) -> int:
    return ((n + m - 1) // m) * m


def dqn_kernel(x_ref, w1_ref, b1_ref, w2_ref, b2_ref, w3_ref, b3_ref, out_ref):
    # x_ref: (TILE_B, S) f32; weights bf16; biases f32; out f32.
    x = x_ref[...].astype(w1_ref.dtype)  # cast to bf16 in-kernel (no wrapper convert op)

    h1 = jnp.dot(x, w1_ref[...], preferred_element_type=jnp.float32) + b1_ref[...]
    h1 = jnp.maximum(h1, 0.0).astype(w2_ref.dtype)

    h2 = jnp.dot(h1, w2_ref[...], preferred_element_type=jnp.float32) + b2_ref[...]
    h2 = jnp.maximum(h2, 0.0).astype(w3_ref.dtype)

    q = jnp.dot(h2, w3_ref[...], preferred_element_type=jnp.float32) + b3_ref[...]
    out_ref[...] = q.astype(out_ref.dtype)


def dqn_forward(x, params, *, tile_b=None, max_tile_b=1024):
    """x: [B, state_size] float32. params: dict from init_params (bf16 weights, f32 biases)."""
    w1, b1 = params["w1"], params["b1"]
    w2, b2 = params["w2"], params["b2"]
    w3, b3 = params["w3"], params["b3"]

    B, S = x.shape
    assert S == w1.shape[0], (S, w1.shape)
    A = w3.shape[1]

    # Pad the batch only to a multiple of 8 (one sublane group), not to a huge tile.
    B8 = _round_up(max(B, 8), 8)

    if tile_b is None:
        n_steps = max(1, pl.cdiv(B8, max_tile_b))
        # v7x: give the "parallel" batch axis >= 2 grid steps once the batch is large,
        # so both TensorCores get work. No cost on single-TC v5e/v6e.
        if B8 >= 1024:
            n_steps = max(n_steps, 2)
        tile_b = _round_up(pl.cdiv(B8, n_steps), 8)
    else:
        tile_b = _round_up(int(tile_b), 8)  # enforce the (8,128) sublane rule
    tile_b = max(8, min(tile_b, B8))

    B_pad = _round_up(B8, tile_b)  # exact multiple of tile_b; waste < n_steps*8 rows
    grid = (B_pad // tile_b,)

    # Only batch padding (zero rows); feature dim stays narrow in HBM.
    xp = x if B_pad == B else jnp.pad(x, ((0, B_pad - B), (0, 0)))

    out = pl.pallas_call(
        dqn_kernel,
        out_shape=jax.ShapeDtypeStruct((B_pad, A), jnp.float32),
        grid=grid,
        in_specs=[
            # x tile pipelined along the batch axis; last dim == full array dim (16).
            pl.BlockSpec((tile_b, S), lambda i: (i, 0)),
            # Weights / biases: full-array blocks, constant index_map -> VMEM-resident.
            pl.BlockSpec(w1.shape, lambda i: (0, 0)),
            pl.BlockSpec(b1.shape, lambda i: (0, 0)),
            pl.BlockSpec(w2.shape, lambda i: (0, 0)),
            pl.BlockSpec(b2.shape, lambda i: (0, 0)),
            pl.BlockSpec(w3.shape, lambda i: (0, 0)),
            pl.BlockSpec(b3.shape, lambda i: (0, 0)),
        ],
        # Narrow f32 output: last dim == full array dim (action_size), contiguous in HBM.
        out_specs=pl.BlockSpec((tile_b, A), lambda i: (i, 0)),
        compiler_params=pltpu.CompilerParams(
            dimension_semantics=("parallel",),
        ),
    )(xp, w1, b1, w2, b2, w3, b3)

    return out if B_pad == B else out[:B]


def init_params(key, state_size, action_size, dtype=jnp.bfloat16):
    """PyTorch-style Linear init U(-1/sqrt(fan_in), 1/sqrt(fan_in)).
    Weights stored [in_features, out_features] (transpose of torch's [out, in]) so
    x @ W matches torch's x @ W.T; biases are [1, out] f32 for 2-D broadcast."""
    ks = jax.random.split(key, 6)
    H1, H2 = 64, 128

    def linear(kw, kb, fan_in, fan_out):
        bound = 1.0 / float(fan_in) ** 0.5
        w = jax.random.uniform(kw, (fan_in, fan_out), jnp.float32, -bound, bound)
        b = jax.random.uniform(kb, (1, fan_out), jnp.float32, -bound, bound)
        return w.astype(dtype), b  # weights bf16, biases stay f32

    w1, b1 = linear(ks[0], ks[1], state_size, H1)
    w2, b2 = linear(ks[2], ks[3], H1, H2)
    w3, b3 = linear(ks[4], ks[5], H2, action_size)

    return {
        "w1": w1, "b1": b1,
        "w2": w2, "b2": b2,
        "w3": w3, "b3": b3,
        "state_size": state_size,
        "action_size": action_size,
    }


def reference_forward(x, params):
    """Plain-JAX mirror of the kernel math (same dtypes / casts)."""
    w1, b1 = params["w1"], params["b1"]
    w2, b2 = params["w2"], params["b2"]
    w3, b3 = params["w3"], params["b3"]

    xb = x.astype(w1.dtype)
    h1 = jnp.maximum(jnp.dot(xb, w1, preferred_element_type=jnp.float32) + b1, 0.0)
    h1 = h1.astype(w2.dtype)
    h2 = jnp.maximum(jnp.dot(h1, w2, preferred_element_type=jnp.float32) + b2, 0.0)
    h2 = h2.astype(w3.dtype)
    return jnp.dot(h2, w3, preferred_element_type=jnp.float32) + b3


if __name__ == "__main__":
    key = jax.random.PRNGKey(0)
    k_params, k_x1, k_x2 = jax.random.split(key, 3)

    state_size = 16
    action_size = 8
    params = init_params(k_params, state_size, action_size)

    # Case 1: batch already a multiple of 8 (no padding path).
    x1 = jax.random.normal(k_x1, (8, state_size), jnp.float32)
    q1 = jax.block_until_ready(dqn_forward(x1, params))
    r1 = reference_forward(x1, params)
    assert q1.shape == (8, action_size)
    assert jnp.allclose(q1, r1, atol=1e-2, rtol=1e-2), float(jnp.max(jnp.abs(q1 - r1)))

    # Case 2: awkward batch (exercises the batch zero-pad + row-slice path).
    x2 = jax.random.normal(k_x2, (5, state_size), jnp.float32)
    q2 = jax.block_until_ready(dqn_forward(x2, params))
    r2 = reference_forward(x2, params)
    assert q2.shape == (5, action_size)
    assert jnp.allclose(q2, r2, atol=1e-2, rtol=1e-2), float(jnp.max(jnp.abs(q2 - r2)))

    print("KERNEL_OK")
</pallas_src>

<mosaic_0001>
module attributes {stable_mosaic.version = 11 : i64} {
  func.func @dqn_kernel(%arg0: i32, %arg1: memref<8x16xf32, #tpu.memory_space<vmem>>, %arg2: memref<16x64xbf16, #tpu.memory_space<vmem>>, %arg3: memref<1x64xf32, #tpu.memory_space<vmem>>, %arg4: memref<64x128xbf16, #tpu.memory_space<vmem>>, %arg5: memref<1x128xf32, #tpu.memory_space<vmem>>, %arg6: memref<128x8xbf16, #tpu.memory_space<vmem>>, %arg7: memref<1x8xf32, #tpu.memory_space<vmem>>, %arg8: memref<8x8xf32, #tpu.memory_space<vmem>>) attributes {dimension_semantics = [#tpu.dimension_semantics<parallel>], iteration_bounds = array<i64: 1>, scalar_prefetch = 0 : i64, scratch_operands = 0 : i64, tpu.core_type = #tpu.core_type<tc>, window_params = [{transform_indices = @transform_0, window_bounds = array<i64: 8, 16>}, {pipeline_mode = #tpu.pipeline_mode<synchronous>, transform_indices = @transform_1, window_bounds = array<i64: 16, 64>}, {pipeline_mode = #tpu.pipeline_mode<synchronous>, transform_indices = @transform_2, window_bounds = array<i64: 1, 64>}, {pipeline_mode = #tpu.pipeline_mode<synchronous>, transform_indices = @transform_3, window_bounds = array<i64: 64, 128>}, {pipeline_mode = #tpu.pipeline_mode<synchronous>, transform_indices = @transform_4, window_bounds = array<i64: 1, 128>}, {pipeline_mode = #tpu.pipeline_mode<synchronous>, transform_indices = @transform_5, window_bounds = array<i64: 128, 8>}, {pipeline_mode = #tpu.pipeline_mode<synchronous>, transform_indices = @transform_6, window_bounds = array<i64: 1, 8>}, {transform_indices = @transform_7, window_bounds = array<i64: 8, 8>}]} {
    %c0 = arith.constant 0 : index
    %c0_0 = arith.constant 0 : index
    %0 = vector.load %arg1[%c0, %c0_0] : memref<8x16xf32, #tpu.memory_space<vmem>>, vector<8x16xf32>
    %1 = arith.truncf %0 : vector<8x16xf32> to vector<8x16xbf16>
    %c0_1 = arith.constant 0 : index
    %c0_2 = arith.constant 0 : index
    %2 = vector.load %arg2[%c0_1, %c0_2] : memref<16x64xbf16, #tpu.memory_space<vmem>>, vector<16x64xbf16>
    %cst = arith.constant dense<0.000000e+00> : vector<8x64xf32>
    %3 = tpu.matmul %1, %2, %cst {dimension_numbers = #tpu.dot_dimension_numbers<[1], [0], [0], [1], [0, 0, 1, 1], [], []>} : vector<8x16xbf16>, vector<16x64xbf16>, vector<8x64xf32> -> vector<8x64xf32>
    %c0_3 = arith.constant 0 : index
    %c0_4 = arith.constant 0 : index
    %4 = vector.load %arg3[%c0_3, %c0_4] : memref<1x64xf32, #tpu.memory_space<vmem>>, vector<1x64xf32>
    %5 = vector.broadcast %4 : vector<1x64xf32> to vector<8x64xf32>
    %6 = arith.addf %3, %5 : vector<8x64xf32>
    %cst_5 = arith.constant 0.000000e+00 : f32
    %7 = vector.broadcast %cst_5 : f32 to vector<8x64xf32>
    %8 = arith.maximumf %6, %7 : vector<8x64xf32>
    %9 = arith.truncf %8 : vector<8x64xf32> to vector<8x64xbf16>
    %c0_6 = arith.constant 0 : index
    %c0_7 = arith.constant 0 : index
    %10 = vector.load %arg4[%c0_6, %c0_7] : memref<64x128xbf16, #tpu.memory_space<vmem>>, vector<64x128xbf16>
    %cst_8 = arith.constant dense<0.000000e+00> : vector<8x128xf32>
    %11 = tpu.matmul %9, %10, %cst_8 {dimension_numbers = #tpu.dot_dimension_numbers<[1], [0], [0], [1], [0, 0, 1, 1], [], []>} : vector<8x64xbf16>, vector<64x128xbf16>, vector<8x128xf32> -> vector<8x128xf32>
    %c0_9 = arith.constant 0 : index
    %c0_10 = arith.constant 0 : index
    %12 = vector.load %arg5[%c0_9, %c0_10] : memref<1x128xf32, #tpu.memory_space<vmem>>, vector<1x128xf32>
    %13 = vector.broadcast %12 : vector<1x128xf32> to vector<8x128xf32>
    %14 = arith.addf %11, %13 : vector<8x128xf32>
    %cst_11 = arith.constant 0.000000e+00 : f32
    %15 = vector.broadcast %cst_11 : f32 to vector<8x128xf32>
    %16 = arith.maximumf %14, %15 : vector<8x128xf32>
    %17 = arith.truncf %16 : vector<8x128xf32> to vector<8x128xbf16>
    %c0_12 = arith.constant 0 : index
    %c0_13 = arith.constant 0 : index
    %18 = vector.load %arg6[%c0_12, %c0_13] : memref<128x8xbf16, #tpu.memory_space<vmem>>, vector<128x8xbf16>
    %cst_14 = arith.constant dense<0.000000e+00> : vector<8x8xf32>
    %19 = tpu.matmul %17, %18, %cst_14 {dimension_numbers = #tpu.dot_dimension_numbers<[1], [0], [0], [1], [0, 0, 1, 1], [], []>} : vector<8x128xbf16>, vector<128x8xbf16>, vector<8x8xf32> -> vector<8x8xf32>
    %c0_15 = arith.constant 0 : index
    %c0_16 = arith.constant 0 : index
    %20 = vector.load %arg7[%c0_15, %c0_16] : memref<1x8xf32, #tpu.memory_space<vmem>>, vector<1x8xf32>
    %21 = vector.broadcast %20 : vector<1x8xf32> to vector<8x8xf32>
    %22 = arith.addf %19, %21 : vector<8x8xf32>
    %c0_17 = arith.constant 0 : index
    %c0_18 = arith.constant 0 : index
    %23 = vector.load %arg8[%c0_17, %c0_18] : memref<8x8xf32, #tpu.memory_space<vmem>>, vector<8x8xf32>
    tpu.vector_store %arg8[%c0_17, %c0_18], %22 {strides = array<i32>} : memref<8x8xf32, #tpu.memory_space<vmem>>, vector<8x8xf32>,
    return
  }
  func.func @transform_0(%arg0: i32) -> (i32, i32) {
    %c0_i32 = arith.constant 0 : i32
    %c0_i32_0 = arith.constant 0 : i32
    return %arg0, %c0_i32 : i32, i32
  }
  func.func @transform_1(%arg0: i32) -> (i32, i32) {
    %c0_i32 = arith.constant 0 : i32
    %c0_i32_0 = arith.constant 0 : i32
    %c0_i32_1 = arith.constant 0 : i32
    return %c0_i32, %c0_i32_0 : i32, i32
  }
  func.func @transform_2(%arg0: i32) -> (i32, i32) {
    %c0_i32 = arith.constant 0 : i32
    %c0_i32_0 = arith.constant 0 : i32
    %c0_i32_1 = arith.constant 0 : i32
    return %c0_i32, %c0_i32_0 : i32, i32
  }
  func.func @transform_3(%arg0: i32) -> (i32, i32) {
    %c0_i32 = arith.constant 0 : i32
    %c0_i32_0 = arith.constant 0 : i32
    %c0_i32_1 = arith.constant 0 : i32
    return %c0_i32, %c0_i32_0 : i32, i32
  }
  func.func @transform_4(%arg0: i32) -> (i32, i32) {
    %c0_i32 = arith.constant 0 : i32
    %c0_i32_0 = arith.constant 0 : i32
    %c0_i32_1 = arith.constant 0 : i32
    return %c0_i32, %c0_i32_0 : i32, i32
  }
  func.func @transform_5(%arg0: i32) -> (i32, i32) {
    %c0_i32 = arith.constant 0 : i32
    %c0_i32_0 = arith.constant 0 : i32
    %c0_i32_1 = arith.constant 0 : i32
    return %c0_i32, %c0_i32_0 : i32, i32
  }
  func.func @transform_6(%arg0: i32) -> (i32, i32) {
    %c0_i32 = arith.constant 0 : i32
    %c0_i32_0 = arith.constant 0 : i32
    %c0_i32_1 = arith.constant 0 : i32
    return %c0_i32, %c0_i32_0 : i32, i32
  }
  func.func @transform_7(%arg0: i32) -> (i32, i32) {
    %c0_i32 = arith.constant 0 : i32
    %c0_i32_0 = arith.constant 0 : i32
    return %arg0, %c0_i32 : i32, i32
  }
}

</mosaic_0001>

<bundles_post_ra>
// kernel: tpu_custom_call.1
= control target key start
LH: loop header
LB: loop body
LE: loop exit
PB: predicated region body
PF: predicated region fallthrough
CT: control target
= control target key end

     0   :  { %v413_v1 = vmov 0.0   ;;  %vm45_vm0 = vcmask 130048   ;;  %vm414_vm1 = vmmov 0   ;;  %s510_s0 = inlined_call_operand.vmem [shape: f32[8,16], index: 0, kind: input, shape index: {}]   ;;  %s511_s1 = inlined_call_operand.vmem [shape: bf16[16,64], index: 1, kind: input, shape index: {}]   ;;  %s512_s2 = inlined_call_operand.vmem [shape: f32[1,64], index: 2, kind: input, shape index: {}]   ;;  %s513_s3 = inlined_call_operand.vmem [shape: bf16[64,128], index: 3, kind: input, shape index: {}]   ;;  %s514_s4 = inlined_call_operand.vmem [shape: f32[1,128], index: 4, kind: input, shape index: {}]   ;;  %s515_s5 = inlined_call_operand.vmem [shape: bf16[128,8], index: 5, kind: input, shape index: {}]   ;;  %s516_s6 = inlined_call_operand.vmem [shape: f32[1,8], index: 6, kind: input, shape index: {}]   ;;  %s517_s7 = inlined_call_operand.hbm [shape: f32[8,8], index: 7, kind: output, shape index: {}]  }
   0x1   :  { %v378_v0 = vld [vmem:[%s511_s1] sm:$0xff]   ;;  %337 = vmatprep.subr.bf16.mxu1 %v413_v1  ;;  %v379_v3 = vld [vmem:[%s513_s3 + $0x18] sm:$0xff]   ;;  %355 = vmatprep.subr.bf16.mxu0 %v413_v1  ;;  %v380_v5 = vld [vmem:[%s513_s3 + $0x10] sm:$0xff]  }
   0x2   :  { %v28_v2 = vld [vmem:[%s510_s0] sm:$0xff]  ;;  %338 = vmatpush3.bf16.msra.mxu1 %v378_v0  ;;  %339 = vmatprep.mubr.msk.bf16.mxu1 %vm414_vm1, %v413_v1 }
   0x3   :  { %v29_v4 = vpack.c.bf16 %v28_v2, %v28_v2  ;;  %343 = vmatprep.subr.bf16.mxu1 %v413_v1  ;;  %371 = vmatprep.mubr.msk.bf16.mxu0 %vm414_vm1, %v413_v1 }
   0x5   :  { %340 = vmatmul.mubr.msk.bf16.vlgmr.msra.gmra.mxu1 %vm45_vm0, %v29_v4 }
   0x6   :  { %344 = vmatpush3.bf16.msra.mxu1 %v379_v3  ;;  %351 = vmatprep.mubr.msk.bf16.mxu1 %vm414_vm1, %v413_v1 }
   0x7   :  { %345 = vmatprep.subr.bf16.mxu1 %v413_v1 }
   0xa   :  { %346 = vmatpush3.bf16.msra.mxu1 %v380_v5 }
   0xb   :  { %12 = vsyncpa [#allocation3], 0  ;;  %347 = vmatprep.subr.bf16.mxu1 %v413_v1  ;;  %v381_v6 = vld [vmem:[%s513_s3 + $0x8] sm:$0xff]   ;;  %v382_v7 = vld [vmem:[%s513_s3] sm:$0xff]   ;;  %vm130_vm2 = vcmask 523264   ;;  %s415_s1 = smov [#allocation2]  }
   0xc   :  { %v383_v8 = vld [vmem:[%s515_s5 + $0x38] sm:$0xff]   ;;  %v384_v9 = vld [vmem:[%s515_s5 + $0x30] sm:$0xff]   ;;  %v385_v10 = vld [vmem:[%s515_s5 + $0x28] sm:$0xff]   ;;  %s295_s0 = sshll.u32 %s415_s1, 4  ;;  %vm287_vm3 = vcmask 64512   ;;  %s296_s0 = int_to_ptr.vmem [resolvable:$true] %s295_s0 }
   0xd   :  { %356 = vmatpush3.bf16.msra.mxu0 %v383_v8  ;;  %v386_v11 = vld [vmem:[%s515_s5 + $0x20] sm:$0xff]   ;;  %v387_v12 = vld [vmem:[%s515_s5 + $0x18] sm:$0xff]   ;;  %v388_v13 = vld [vmem:[%s515_s5 + $0x10] sm:$0xff]   ;;  %p396_p1 = scmp.lt.s32.totalorder %s296_s0, %s296_s0 }
   0xe   :  { %348 = vmatpush3.bf16.msra.mxu1 %v381_v6  ;;  %357 = vmatprep.subr.bf16.mxu0 %v413_v1  ;;  %v303_v14 = vld [vmem:[%s512_s2] ss:$0 sm:$0xff]  ;;  %v389_v22 = vld [vmem:[%s515_s5 + $0x8] sm:$0xff]  }
   0xf   :  { %349 = vmatprep.subr.bf16.mxu1 %v413_v1  ;;  %v390_v23 = vld [vmem:[%s515_s5] sm:$0xff]  }
  0x10   :  { %v306_v24 = vld [vmem:[%s514_s4] ss:$0 sm:$0xff]  ;;  %s391_s4 = scalar_lea.vmem %s296_s0, 128 }
  0x11   :  { %358 = vmatpush3.bf16.msra.mxu0 %v384_v9  ;;  %v312_v32 = vld [vmem:[%s516_s6] ss:$0 sm:$0xff]  ;;  %p392_p0 = scmp.ne.s32.totalorder %s296_s0, %s391_s4  ;;  %p397_p2 = scmp.lt.s32.totalorder %s391_s4, %s391_s4 }
  0x12   :  { %350 = vmatpush3.bf16.msra.mxu1 %v382_v7  ;;  %359 = vmatprep.subr.bf16.mxu0 %v413_v1 }
  0x13   :  { %p398_p3 = por %p397_p2, %p396_p1 }
  0x15   :  { %360 = vmatpush3.bf16.msra.mxu0 %v385_v10  ;;  %p399_p4 = pnand %p398_p3, %p392_p0 }
  0x16   :  { %361 = vmatprep.subr.bf16.mxu0 %v413_v1 }
  0x19   :  { %362 = vmatpush3.bf16.msra.mxu0 %v386_v11 }
  0x1a   :  { %363 = vmatprep.subr.bf16.mxu0 %v413_v1 }
  0x1d   :  { %364 = vmatpush3.bf16.msra.mxu0 %v387_v12 }
  0x1e   :  { %365 = vmatprep.subr.bf16.mxu0 %v413_v1 }
  0x21   :  { %366 = vmatpush3.bf16.msra.mxu0 %v388_v13 }
  0x22   :  { %367 = vmatprep.subr.bf16.mxu0 %v413_v1 }
  0x25   :  { %368 = vmatpush3.bf16.msra.mxu0 %v389_v22 }
  0x26   :  { %369 = vmatprep.subr.bf16.mxu0 %v413_v1 }
  0x29   :  { %370 = vmatpush3.bf16.msra.mxu0 %v390_v23 }
  0xc5   :  { %v83_v15 = vpop.f32.mrf.mxu1 }
  0xc6   :  { %v84_v16 = vadd.f32 %v303_v14, %v83_v15 }
  0xc7   :  { %v341_v17 = vpop.f32.mrf.mxu1 }
  0xc8   :  { %v89_v18 = vmax.f32 %v84_v16, 0.0 }
  0xc9   :  { %v86_v19 = vpop.f32.mrf.mxu1 }
  0xca   :  { %v90_v20 = vpack.c.bf16 %v89_v18, %v89_v18 }
  0xcb   :  { %v342_v21 = vpop.f32.mrf.mxu1 }
  0xcc   :  { %352 = vmatmul.mubr.msk.bf16.vlgmr.msra.gmra.mxu1 %vm130_vm2, %v90_v20 }
 0x18c   :  { %v168_v25 = vpop.f32.mrf.mxu1 }
 0x18d   :  { %v169_v26 = vadd.f32 %v306_v24, %v168_v25 }
 0x18e   :  { %v353_v27 = vpop.f32.mrf.mxu1 }
 0x18f   :  { %v174_v28 = vmax.f32 %v169_v26, 0.0 }
 0x190   :  { %v171_v29 = vpop.f32.mrf.mxu1 }
 0x191   :  { %v175_v30 = vpack.c.bf16 %v174_v28, %v174_v28 }
 0x192   :  { %v354_v31 = vpop.f32.mrf.mxu1 }
 0x193   :  { %372 = vmatmul.mubr.bf16.vlgmr.msra.gmra.mxu0 %v175_v30 }
 0x253   :  { %v281_v33 = vpop.f32.mrf.mxu0 }
 0x254   :  { %v282_v34 = vadd.f32 %v312_v32, %v281_v33 }
 0x255   :  { %v373_v35 = vpop.f32.mrf.mxu0 }
 0x256   :  { %288 = vst.msk [vmem:[#allocation2] sm:$0xff] %vm287_vm3, %v282_v34 }
 0x257   :  { %v284_v36 = vpop.f32.mrf.mxu0 }
 0x258   :  { %402 = shalt.err (!%p399_p4)
}
 0x259   :  { %298 = dma.vmem_to_hbm [thread:$0]  %s296_s0, 128, %s517_s7, [#allocation3]   ;;  %v374_v37 = vpop.f32.mrf.mxu0 }
 0x25a   :  { %411 = dma.done.wait [#allocation3], 128  }
 0x25b   :  { %412 = vsyncadd [#allocation3], 4294967168 }
 0x25c   :  { %302 = vsyncpa [#allocation3], 1 }

</bundles_post_ra>
